<compile_context>
chip_gen: v5e
topology: v5e:2x2
jax: 0.10.0
libtpu: 0.0.40
codegen_flags: <defaults>
</compile_context>

<pallas_src>
import functools

import jax
import jax.numpy as jnp
from jax.experimental import pallas as pl
from jax.experimental.pallas import tpu as pltpu


def _round_up(x, m):
    return ((x + m - 1) // m) * m


def mlp_kernel(x_ref, w1_ref, b1_ref, w2_ref, b2_ref, out_ref):
    # fc1: x @ W1 (already (in, hidden)) + b1, then tanh. f32 accumulation.
    h = jnp.dot(x_ref[...], w1_ref[...], preferred_element_type=jnp.float32)
    h = jnp.tanh(h + b1_ref[...])          # b1 is (1, hidden_p) -> broadcasts
    # fc2: h @ W2 (already (hidden, out)) + b2. h stays in VMEM/vregs.
    y = jnp.dot(h, w2_ref[...], preferred_element_type=jnp.float32)
    out_ref[...] = (y + b2_ref[...]).astype(out_ref.dtype)


@functools.partial(jax.jit, static_argnames=("block_batch",))
def mlp_forward(x, w1, b1, w2, b2, *, block_batch=128):
    """x: (batch, in). w1: (hidden, in), b1: (hidden,), w2: (out, hidden), b2: (out,).

    Matches PyTorch nn.Linear convention for the parameter shapes; the
    transpose to MXU-friendly (in, out) layout happens once here at trace time.
    """
    batch, input_size = x.shape
    hidden_size, _ = w1.shape
    output_size, _ = w2.shape

    # Lane-dense padding: last dims to multiples of 128, batch tile to
    # multiples of 8 (sublane) capped at block_batch.
    in_p = _round_up(input_size, 128)
    hid_p = _round_up(hidden_size, 128)
    out_p = _round_up(output_size, 128)
    bm = min(block_batch, _round_up(batch, 8))
    batch_p = _round_up(batch, bm)

    # Pre-transpose + zero-pad weights/biases (done in plain XLA, outside the kernel).
    x_p = jnp.zeros((batch_p, in_p), jnp.float32).at[:batch, :input_size].set(x)
    w1t = jnp.zeros((in_p, hid_p), jnp.float32).at[:input_size, :hidden_size].set(w1.T)
    w2t = jnp.zeros((hid_p, out_p), jnp.float32).at[:hidden_size, :output_size].set(w2.T)
    b1p = jnp.zeros((1, hid_p), jnp.float32).at[0, :hidden_size].set(b1)
    b2p = jnp.zeros((1, out_p), jnp.float32).at[0, :output_size].set(b2)

    grid = (batch_p // bm,)

    # VMEM budget: double-buffered x/out tiles + resident (but still
    # double-buffered by BlockSpec) weights/biases + h live range. Cap at the
    # v7x scoped limit.
    f32 = 4
    vmem_bytes = f32 * (
        2 * bm * (in_p + out_p)                       # x / out tiles (x2 buffers)
        + 2 * (in_p * hid_p + hid_p * out_p)          # W1, W2
        + 2 * (hid_p + out_p)                         # biases
        + bm * hid_p                                  # h intermediate
    ) + (1 << 20)                                     # headroom
    vmem_limit = min(vmem_bytes, 32 * 1024 * 1024)

    out_padded = pl.pallas_call(
        mlp_kernel,
        out_shape=jax.ShapeDtypeStruct((batch_p, out_p), jnp.float32),
        grid_spec=pltpu.PrefetchScalarGridSpec(
            num_scalar_prefetch=0,
            grid=grid,
            in_specs=[
                pl.BlockSpec((bm, in_p), lambda i: (i, 0)),      # x tile per step
                pl.BlockSpec((in_p, hid_p), lambda i: (0, 0)),   # W1 resident
                pl.BlockSpec((1, hid_p), lambda i: (0, 0)),      # b1 resident
                pl.BlockSpec((hid_p, out_p), lambda i: (0, 0)),  # W2 resident
                pl.BlockSpec((1, out_p), lambda i: (0, 0)),      # b2 resident
            ],
            out_specs=pl.BlockSpec((bm, out_p), lambda i: (i, 0)),
        ),
        compiler_params=pltpu.CompilerParams(
            dimension_semantics=("parallel",),
            vmem_limit_bytes=int(vmem_limit),
        ),
    )(x_p, w1t, b1p, w2t, b2p)

    # Slice away the padding (pure layout plumbing, fused by XLA).
    return out_padded[:batch, :output_size]


def xavier_uniform(key, shape, dtype=jnp.float32):
    # PyTorch xavier_uniform_ for a Linear weight of shape (fan_out, fan_in)
    fan_out, fan_in = shape
    limit = (6.0 / (fan_in + fan_out)) ** 0.5
    return jax.random.uniform(key, shape, dtype, minval=-limit, maxval=limit)


def init_mlp_params(key, input_size, hidden_size, output_size, zero_init=False):
    if zero_init:
        w1 = jnp.zeros((hidden_size, input_size), jnp.float32)
        w2 = jnp.zeros((output_size, hidden_size), jnp.float32)
    else:
        k1, k2 = jax.random.split(key)
        w1 = xavier_uniform(k1, (hidden_size, input_size))
        w2 = xavier_uniform(k2, (output_size, hidden_size))
    b1 = jnp.zeros((hidden_size,), jnp.float32)
    b2 = jnp.zeros((output_size,), jnp.float32)
    return w1, b1, w2, b2


if __name__ == "__main__":
    key = jax.random.PRNGKey(0)
    k_params, k_x = jax.random.split(key)

    batch = 8
    input_size = 16
    hidden_size = 32
    output_size = 8

    w1, b1, w2, b2 = init_mlp_params(k_params, input_size, hidden_size, output_size)
    x = jax.random.normal(k_x, (batch, input_size), jnp.float32)

    out = mlp_forward(x, w1, b1, w2, b2)
    jax.block_until_ready(out)

    # Reference check in plain JAX (same math as the PyTorch forward).
    ref = jnp.tanh(x @ w1.T + b1) @ w2.T + b2
    assert out.shape == (batch, output_size)
    assert jnp.allclose(out, ref, atol=1e-5, rtol=1e-5)

    print("KERNEL_OK")
</pallas_src>

<mosaic_0001>
module attributes {stable_mosaic.version = 11 : i64} {
  func.func @mlp_kernel(%arg0: i32, %arg1: memref<8x128xf32, #tpu.memory_space<vmem>>, %arg2: memref<128x128xf32, #tpu.memory_space<vmem>>, %arg3: memref<1x128xf32, #tpu.memory_space<vmem>>, %arg4: memref<128x128xf32, #tpu.memory_space<vmem>>, %arg5: memref<1x128xf32, #tpu.memory_space<vmem>>, %arg6: memref<8x128xf32, #tpu.memory_space<vmem>>) attributes {dimension_semantics = [#tpu.dimension_semantics<parallel>], iteration_bounds = array<i64: 1>, scalar_prefetch = 0 : i64, scratch_operands = 0 : i64, tpu.core_type = #tpu.core_type<tc>, window_params = [{transform_indices = @transform_0, window_bounds = array<i64: 8, 128>}, {pipeline_mode = #tpu.pipeline_mode<synchronous>, transform_indices = @transform_1, window_bounds = array<i64: 128, 128>}, {pipeline_mode = #tpu.pipeline_mode<synchronous>, transform_indices = @transform_2, window_bounds = array<i64: 1, 128>}, {pipeline_mode = #tpu.pipeline_mode<synchronous>, transform_indices = @transform_3, window_bounds = array<i64: 128, 128>}, {pipeline_mode = #tpu.pipeline_mode<synchronous>, transform_indices = @transform_4, window_bounds = array<i64: 1, 128>}, {transform_indices = @transform_5, window_bounds = array<i64: 8, 128>}]} {
    %c0 = arith.constant 0 : index
    %c0_0 = arith.constant 0 : index
    %0 = vector.load %arg1[%c0, %c0_0] : memref<8x128xf32, #tpu.memory_space<vmem>>, vector<8x128xf32>
    %c0_1 = arith.constant 0 : index
    %c0_2 = arith.constant 0 : index
    %1 = vector.load %arg2[%c0_1, %c0_2] : memref<128x128xf32, #tpu.memory_space<vmem>>, vector<128x128xf32>
    %cst = arith.constant dense<0.000000e+00> : vector<8x128xf32>
    %2 = tpu.matmul %0, %1, %cst {dimension_numbers = #tpu.dot_dimension_numbers<[1], [0], [0], [1], [0, 0, 1, 1], [], []>} : vector<8x128xf32>, vector<128x128xf32>, vector<8x128xf32> -> vector<8x128xf32>
    %c0_3 = arith.constant 0 : index
    %c0_4 = arith.constant 0 : index
    %3 = vector.load %arg3[%c0_3, %c0_4] : memref<1x128xf32, #tpu.memory_space<vmem>>, vector<1x128xf32>
    %4 = vector.broadcast %3 : vector<1x128xf32> to vector<8x128xf32>
    %5 = arith.addf %2, %4 : vector<8x128xf32>
    %6 = math.tanh %5 : vector<8x128xf32>
    %c0_5 = arith.constant 0 : index
    %c0_6 = arith.constant 0 : index
    %7 = vector.load %arg4[%c0_5, %c0_6] : memref<128x128xf32, #tpu.memory_space<vmem>>, vector<128x128xf32>
    %cst_7 = arith.constant dense<0.000000e+00> : vector<8x128xf32>
    %8 = tpu.matmul %6, %7, %cst_7 {dimension_numbers = #tpu.dot_dimension_numbers<[1], [0], [0], [1], [0, 0, 1, 1], [], []>} : vector<8x128xf32>, vector<128x128xf32>, vector<8x128xf32> -> vector<8x128xf32>
    %c0_8 = arith.constant 0 : index
    %c0_9 = arith.constant 0 : index
    %9 = vector.load %arg5[%c0_8, %c0_9] : memref<1x128xf32, #tpu.memory_space<vmem>>, vector<1x128xf32>
    %10 = vector.broadcast %9 : vector<1x128xf32> to vector<8x128xf32>
    %11 = arith.addf %8, %10 : vector<8x128xf32>
    %c0_10 = arith.constant 0 : index
    %c0_11 = arith.constant 0 : index
    %12 = vector.load %arg6[%c0_10, %c0_11] : memref<8x128xf32, #tpu.memory_space<vmem>>, vector<8x128xf32>
    tpu.vector_store %arg6[%c0_10, %c0_11], %11 {strides = array<i32>} : memref<8x128xf32, #tpu.memory_space<vmem>>, vector<8x128xf32>,
    return
  }
  func.func @transform_0(%arg0: i32) -> (i32, i32) {
    %c0_i32 = arith.constant 0 : i32
    %c0_i32_0 = arith.constant 0 : i32
    return %arg0, %c0_i32 : i32, i32
  }
  func.func @transform_1(%arg0: i32) -> (i32, i32) {
    %c0_i32 = arith.constant 0 : i32
    %c0_i32_0 = arith.constant 0 : i32
    %c0_i32_1 = arith.constant 0 : i32
    return %c0_i32, %c0_i32_0 : i32, i32
  }
  func.func @transform_2(%arg0: i32) -> (i32, i32) {
    %c0_i32 = arith.constant 0 : i32
    %c0_i32_0 = arith.constant 0 : i32
    %c0_i32_1 = arith.constant 0 : i32
    return %c0_i32, %c0_i32_0 : i32, i32
  }
  func.func @transform_3(%arg0: i32) -> (i32, i32) {
    %c0_i32 = arith.constant 0 : i32
    %c0_i32_0 = arith.constant 0 : i32
    %c0_i32_1 = arith.constant 0 : i32
    return %c0_i32, %c0_i32_0 : i32, i32
  }
  func.func @transform_4(%arg0: i32) -> (i32, i32) {
    %c0_i32 = arith.constant 0 : i32
    %c0_i32_0 = arith.constant 0 : i32
    %c0_i32_1 = arith.constant 0 : i32
    return %c0_i32, %c0_i32_0 : i32, i32
  }
  func.func @transform_5(%arg0: i32) -> (i32, i32) {
    %c0_i32 = arith.constant 0 : i32
    %c0_i32_0 = arith.constant 0 : i32
    return %arg0, %c0_i32 : i32, i32
  }
}

</mosaic_0001>

<bundles_post_ra>
// kernel: mlp_forward.1
= control target key start
LH: loop header
LB: loop body
LE: loop exit
PB: predicated region body
PF: predicated region fallthrough
CT: control target
= control target key end

     0   :  { %s290_s0 = inlined_call_operand.vmem [shape: f32[8,128], index: 0, kind: input, shape index: {}]   ;;  %s291_s1 = inlined_call_operand.vmem [shape: f32[128,128], index: 1, kind: input, shape index: {}]   ;;  %s292_s2 = inlined_call_operand.vmem [shape: f32[1,128], index: 2, kind: input, shape index: {}]   ;;  %s293_s3 = inlined_call_operand.vmem [shape: f32[128,128], index: 3, kind: input, shape index: {}]   ;;  %s294_s4 = inlined_call_operand.vmem [shape: f32[1,128], index: 4, kind: input, shape index: {}]   ;;  %s295_s5 = inlined_call_operand.hbm [shape: f32[8,128], index: 5, kind: output, shape index: {}]  }
   0x1   :  { %v37_v0 = vld [vmem:[%s291_s1 + $0x78] sm:$0xff]  ;;  %v36_v1 = vld [vmem:[%s291_s1 + $0x70] sm:$0xff]  ;;  %v35_v2 = vld [vmem:[%s291_s1 + $0x68] sm:$0xff] }
   0x2   :  { %42 = vmatpush.msra.mxu0 %v37_v0  ;;  %v34_v3 = vld [vmem:[%s291_s1 + $0x60] sm:$0xff]  ;;  %v78_v4 = vld [vmem:[%s293_s3 + $0x78] sm:$0xff]  ;;  %v77_v6 = vld [vmem:[%s293_s3 + $0x70] sm:$0xff] }
   0x3   :  { %v33_v5 = vld [vmem:[%s291_s1 + $0x58] sm:$0xff]  ;;  %83 = vmatpush.msra.mxu1 %v78_v4  ;;  %v76_v7 = vld [vmem:[%s293_s3 + $0x68] sm:$0xff]  ;;  %v32_v8 = vld [vmem:[%s291_s1 + $0x50] sm:$0xff] }
   0x4   :  { %43 = vmatpush.msra.mxu0 %v36_v1  ;;  %v75_v9 = vld [vmem:[%s293_s3 + $0x60] sm:$0xff]  ;;  %v31_v10 = vld [vmem:[%s291_s1 + $0x48] sm:$0xff] }
   0x5   :  { %84 = vmatpush.msra.mxu1 %v77_v6 }
   0x6   :  { %44 = vmatpush.msra.mxu0 %v35_v2 }
   0x7   :  { %85 = vmatpush.msra.mxu1 %v76_v7 }
   0x8   :  { %45 = vmatpush.msra.mxu0 %v34_v3 }
   0xa   :  { %46 = vmatpush.msra.mxu0 %v33_v5 }
   0xb   :  { %10 = vsyncpa [#allocation3], 0  ;;  %v74_v11 = vld [vmem:[%s293_s3 + $0x58] sm:$0xff]  ;;  %v30_v12 = vld [vmem:[%s291_s1 + $0x40] sm:$0xff]  ;;  %86 = vmatpush.msra.mxu1 %v75_v9  ;;  %s151_s11 = smov [#allocation2]  }
   0xc   :  { %47 = vmatpush.msra.mxu0 %v32_v8  ;;  %v73_v13 = vld [vmem:[%s293_s3 + $0x50] sm:$0xff]  ;;  %v29_v14 = vld [vmem:[%s291_s1 + $0x38] sm:$0xff]  ;;  %v72_v15 = vld [vmem:[%s293_s3 + $0x48] sm:$0xff]  ;;  %s109_s12 = sshll.u32 %s151_s11, 4  ;;  %s110_s12 = int_to_ptr.vmem [resolvable:$true] %s109_s12 }
   0xd   :  { %87 = vmatpush.msra.mxu1 %v74_v11  ;;  %v28_v16 = vld [vmem:[%s291_s1 + $0x30] sm:$0xff]  ;;  %v71_v17 = vld [vmem:[%s293_s3 + $0x40] sm:$0xff]  ;;  %v27_v18 = vld [vmem:[%s291_s1 + $0x28] sm:$0xff] }
   0xe   :  { %48 = vmatpush.msra.mxu0 %v31_v10  ;;  %v70_v19 = vld [vmem:[%s293_s3 + $0x38] sm:$0xff]  ;;  %v26_v20 = vld [vmem:[%s291_s1 + $0x20] sm:$0xff]  ;;  %v69_v21 = vld [vmem:[%s293_s3 + $0x30] sm:$0xff] }
   0xf   :  { %88 = vmatpush.msra.mxu1 %v73_v13  ;;  %v25_v22 = vld [vmem:[%s291_s1 + $0x18] sm:$0xff]  ;;  %v68_v23 = vld [vmem:[%s293_s3 + $0x28] sm:$0xff]  ;;  %v24_v24 = vld [vmem:[%s291_s1 + $0x10] sm:$0xff] }
  0x10   :  { %49 = vmatpush.msra.mxu0 %v30_v12  ;;  %v23_v25 = vld [vmem:[%s291_s1 + $0x8] sm:$0xff]  ;;  %v22_v26 = vld [vmem:[%s291_s1] sm:$0xff]  ;;  %v66_v29 = vld [vmem:[%s293_s3 + $0x18] sm:$0xff] }
  0x11   :  { %89 = vmatpush.msra.mxu1 %v72_v15  ;;  %v21_v27 = vld [vmem:[%s290_s0] sm:$0xff]  ;;  %v65_v30 = vld [vmem:[%s293_s3 + $0x10] sm:$0xff]  ;;  %v64_v31 = vld [vmem:[%s293_s3 + $0x8] sm:$0xff] }
  0x12   :  { %50 = vmatpush.msra.mxu0 %v29_v14  ;;  %v67_v28 = vld [vmem:[%s293_s3 + $0x20] sm:$0xff] }
  0x13   :  { %90 = vmatpush.msra.mxu1 %v71_v17  ;;  %v63_v32 = vld [vmem:[%s293_s3] sm:$0xff]  ;;  %s111_s3 = sshll.u32 %s295_s5, 4  ;;  %s112_s3 = int_to_ptr.hbm [resolvable:$true] %s111_s3 }
  0x14   :  { %51 = vmatpush.msra.mxu0 %v28_v16  ;;  %v121_v33 = vld [vmem:[%s292_s2] ss:$0 sm:$0xff] }
  0x15   :  { %91 = vmatpush.msra.mxu1 %v70_v19  ;;  %v122_v37 = vld [vmem:[%s294_s4] ss:$0 sm:$0xff] }
  0x16   :  { %52 = vmatpush.msra.mxu0 %v27_v18 }
  0x17   :  { %92 = vmatpush.msra.mxu1 %v69_v21 }
  0x18   :  { %53 = vmatpush.msra.mxu0 %v26_v20 }
  0x19   :  { %93 = vmatpush.msra.mxu1 %v68_v23 }
  0x1a   :  { %54 = vmatpush.msra.mxu0 %v25_v22 }
  0x1b   :  { %94 = vmatpush.msra.mxu1 %v67_v28 }
  0x1c   :  { %55 = vmatpush.msra.mxu0 %v24_v24 }
  0x1d   :  { %95 = vmatpush.msra.mxu1 %v66_v29 }
  0x1e   :  { %56 = vmatpush.msra.mxu0 %v23_v25 }
  0x1f   :  { %96 = vmatpush.msra.mxu1 %v65_v30 }
  0x20   :  { %57 = vmatpush.msra.mxu0 %v22_v26 }
  0x21   :  { %58 = vmatmul.f32.vlgmr.msra.gmra.mxu0 %v21_v27  ;;  %97 = vmatpush.msra.mxu1 %v64_v31 }
  0x23   :  { %98 = vmatpush.msra.mxu1 %v63_v32 }
  0x9e   :  { %v59_v34 = vpop.f32.mrf.mxu0 }
  0x9f   :  { %v60_v35 = vadd.f32 %v121_v33, %v59_v34 }
  0xa1   :  { %123 = vtanh.f32 %v60_v35 }
  0xa7   :  { %v124_v36 = vpop.eup %123 }
  0xa8   :  { %99 = vmatmul.f32.vlgmr.msra.gmra.mxu1 %v124_v36 }
 0x125   :  { %v100_v38 = vpop.f32.mrf.mxu1 }
 0x126   :  { %v101_v39 = vadd.f32 %v122_v37, %v100_v38 }
 0x128   :  { %103 = vst [vmem:[#allocation2] sm:$0xff] %v101_v39 }
 0x129   :  { %114 = dma.vmem_to_hbm [thread:$0]  %s110_s12, 128, %s112_s3, [#allocation3]  }
 0x12a   :  { %149 = dma.done.wait [#allocation3], 128  }
 0x12b   :  { %150 = vsyncadd [#allocation3], 4294967168 }
 0x12c   :  { %119 = vsyncpa [#allocation3], 1 }

</bundles_post_ra>
